<compile_context>
chip_gen: v6e
topology: v6e:2x2x1
jax: 0.10.0
libtpu: 0.0.40
codegen_flags: <defaults>
</compile_context>

<pallas_src>
import functools

import numpy as np
import jax
import jax.numpy as jnp
from jax.experimental import pallas as pl
from jax.experimental.pallas import tpu as pltpu


def _round_up(x, m):
    return ((x + m - 1) // m) * m


@functools.lru_cache(maxsize=None)
def _dft_kron_ops(h, w):
    """Cached (HW, HW) real/imag Kronecker 2D-DFT operators, built in f64."""
    def cs(n):
        k = np.arange(n, dtype=np.float64)
        ang = 2.0 * np.pi * np.outer(k, k) / n
        # F[k, m] = exp(-2*pi*i*k*m/n) = cos(ang) - i*sin(ang)
        return np.cos(ang), -np.sin(ang)

    ch, sh = cs(h)
    cw, sw = cs(w)
    mr = np.kron(ch, cw) - np.kron(sh, sw)   # real part
    mi = np.kron(ch, sw) + np.kron(sh, cw)   # imag part
    return jnp.asarray(mr, jnp.float32), jnp.asarray(mi, jnp.float32)


def _ffl_kernel(pred_ref, targ_ref, mr_ref, mi_ref, out_ref):
    # pred_ref/targ_ref: (TB, HW) f32 tiles; mr_ref/mi_ref: (HW, HW) f32 resident.
    d = pred_ref[...] - targ_ref[...]                       # VPU subtract

    # fft2(pred) - fft2(target) == fft2(pred - target): two matmuls, not four.
    dr = jnp.dot(d, mr_ref[...], preferred_element_type=jnp.float32)
    di = jnp.dot(d, mi_ref[...], preferred_element_type=jnp.float32)

    dist = dr * dr + di * di                                # |dF|^2, (TB, HW)
    s = jnp.sqrt(dist)                                      # |dF|
    # per-image (row) max of sqrt(dist); w = s / rowmax; w*dist = dist*s/rowmax
    rowmax = jnp.max(s, axis=1, keepdims=True)              # (TB, 1)
    rinv = jnp.where(rowmax > 0.0,
                     pl.reciprocal(rowmax, approx=True),    # EUP, ~free slot
                     0.0)                                    # 0-max (incl. pad) -> 0
    wnorm = dist * s * rinv                                 # == w * freq_distance

    # lane-dense partial sum for this tile: fold HW lanes down to 128, then
    # a single sublane reduce; stored unmasked as (1, 128).
    tb, hw = wnorm.shape
    acc = jnp.zeros((tb, 128), jnp.float32)
    for j in range(hw // 128):                              # static, aligned slices
        acc = acc + wnorm[:, j * 128:(j + 1) * 128]
    out_ref[...] = jnp.sum(acc, axis=0, keepdims=True)      # (1, 128)


def focal_frequency_loss(pred, target, loss_weight=1.0, alpha=1.0):
    """pred, target: (N, C, H, W) float arrays. Returns scalar loss (f32)."""
    assert alpha == 1.0, "kernel specializes alpha == 1.0 (module default)"
    N, C, H, W = pred.shape
    B, HW = N * C, H * W
    assert HW % 128 == 0, "kernel assumes H*W to be a multiple of 128"

    mr, mi = _dft_kron_ops(H, W)                            # cached per (H, W)

    # Batch tile: fill the MXU M dimension up to 128 rows; pad B to tile multiple.
    TB = min(128, _round_up(B, 8))
    B_pad = _round_up(B, TB)
    num_tiles = B_pad // TB

    p2 = pred.reshape(B, HW).astype(jnp.float32)
    t2 = target.reshape(B, HW).astype(jnp.float32)
    if B_pad != B:
        padw = ((0, B_pad - B), (0, 0))
        p2 = jnp.pad(p2, padw)
        t2 = jnp.pad(t2, padw)                              # pad rows -> 0 contribution

    # Cost hint: 2 matmuls of (TB,HW)x(HW,HW) per tile + elementwise.
    flops = num_tiles * (2 * 2 * TB * HW * HW + 10 * TB * HW)
    transcendentals = B_pad * HW + B_pad                    # sqrt per elem + recip per row
    bytes_accessed = (2 * B_pad * HW + 2 * HW * HW + num_tiles * 128) * 4
    cost = pl.CostEstimate(flops=flops, transcendentals=transcendentals,
                           bytes_accessed=bytes_accessed)

    # VMEM budget: resident operators (x2 buffers) + double-buffered input tiles.
    op_bytes = 4 * HW * HW * 4
    tile_bytes = 4 * TB * HW * 4
    vmem_limit = min(64 << 20, max(16 << 20, op_bytes + tile_bytes + (4 << 20)))

    partials = pl.pallas_call(
        _ffl_kernel,
        out_shape=jax.ShapeDtypeStruct((num_tiles, 128), jnp.float32),
        grid=(num_tiles,),
        in_specs=[
            pl.BlockSpec((TB, HW), lambda i: (i, 0)),
            pl.BlockSpec((TB, HW), lambda i: (i, 0)),
            pl.BlockSpec((HW, HW), lambda i: (0, 0)),       # operator stays resident
            pl.BlockSpec((HW, HW), lambda i: (0, 0)),
        ],
        out_specs=pl.BlockSpec((1, 128), lambda i: (i, 0)),
        compiler_params=pltpu.CompilerParams(
            dimension_semantics=("parallel",),
            vmem_limit_bytes=vmem_limit),
        cost_estimate=cost,
    )(p2, t2, mr, mi)

    # Padded rows contributed exactly 0; divide by the TRUE element count.
    return (jnp.sum(partials) / (B * HW)) * loss_weight


def _reference_loss(pred, target):
    # Pure-JAX reference mirroring the PyTorch module (default flags).
    pf = jnp.fft.fft2(pred)
    tf = jnp.fft.fft2(target)
    d = pf - tf
    dist = jnp.real(d) ** 2 + jnp.imag(d) ** 2
    w = jnp.sqrt(dist)
    wmax = jnp.max(w, axis=(-2, -1), keepdims=True)
    w = w / wmax
    w = jnp.where(jnp.isnan(w), 0.0, w)
    w = jnp.clip(w, 0.0, 1.0)
    return jnp.mean(w * dist)


if __name__ == "__main__":
    key = jax.random.PRNGKey(0)
    k1, k2 = jax.random.split(key)
    N, C, H, W = 2, 4, 16, 16
    pred = jax.random.normal(k1, (N, C, H, W), dtype=jnp.float32)
    target = jax.random.normal(k2, (N, C, H, W), dtype=jnp.float32)

    loss = focal_frequency_loss(pred, target)
    loss = jax.block_until_ready(loss)

    ref = jax.block_until_ready(_reference_loss(pred, target))
    # Lenient tolerance: DFT-by-matmul on the MXU + approx reciprocal vs XLA FFT.
    assert jnp.allclose(loss, ref, rtol=5e-2, atol=1e-3), (loss, ref)

    print("KERNEL_OK")
</pallas_src>

<mosaic_0001>
module attributes {stable_mosaic.version = 11 : i64} {
  func.func @_ffl_kernel(%arg0: i32, %arg1: memref<8x256xf32, #tpu.memory_space<vmem>>, %arg2: memref<8x256xf32, #tpu.memory_space<vmem>>, %arg3: memref<256x256xf32, #tpu.memory_space<vmem>>, %arg4: memref<256x256xf32, #tpu.memory_space<vmem>>, %arg5: memref<1x128xf32, #tpu.memory_space<vmem>>) attributes {dimension_semantics = [#tpu.dimension_semantics<parallel>], iteration_bounds = array<i64: 1>, scalar_prefetch = 0 : i64, scratch_operands = 0 : i64, tpu.core_type = #tpu.core_type<tc>, window_params = [{transform_indices = @transform_0, window_bounds = array<i64: 8, 256>}, {transform_indices = @transform_1, window_bounds = array<i64: 8, 256>}, {pipeline_mode = #tpu.pipeline_mode<synchronous>, transform_indices = @transform_2, window_bounds = array<i64: 256, 256>}, {pipeline_mode = #tpu.pipeline_mode<synchronous>, transform_indices = @transform_3, window_bounds = array<i64: 256, 256>}, {transform_indices = @transform_4, window_bounds = array<i64: 1, 128>}]} {
    %c0 = arith.constant 0 : index
    %c0_0 = arith.constant 0 : index
    %0 = vector.load %arg1[%c0, %c0_0] : memref<8x256xf32, #tpu.memory_space<vmem>>, vector<8x256xf32>
    %c0_1 = arith.constant 0 : index
    %c0_2 = arith.constant 0 : index
    %1 = vector.load %arg2[%c0_1, %c0_2] : memref<8x256xf32, #tpu.memory_space<vmem>>, vector<8x256xf32>
    %2 = arith.subf %0, %1 : vector<8x256xf32>
    %c0_3 = arith.constant 0 : index
    %c0_4 = arith.constant 0 : index
    %3 = vector.load %arg3[%c0_3, %c0_4] : memref<256x256xf32, #tpu.memory_space<vmem>>, vector<256x256xf32>
    %cst = arith.constant dense<0.000000e+00> : vector<8x256xf32>
    %4 = tpu.matmul %2, %3, %cst {dimension_numbers = #tpu.dot_dimension_numbers<[1], [0], [0], [1], [0, 0, 1, 1], [], []>} : vector<8x256xf32>, vector<256x256xf32>, vector<8x256xf32> -> vector<8x256xf32>
    %c0_5 = arith.constant 0 : index
    %c0_6 = arith.constant 0 : index
    %5 = vector.load %arg4[%c0_5, %c0_6] : memref<256x256xf32, #tpu.memory_space<vmem>>, vector<256x256xf32>
    %cst_7 = arith.constant dense<0.000000e+00> : vector<8x256xf32>
    %6 = tpu.matmul %2, %5, %cst_7 {dimension_numbers = #tpu.dot_dimension_numbers<[1], [0], [0], [1], [0, 0, 1, 1], [], []>} : vector<8x256xf32>, vector<256x256xf32>, vector<8x256xf32> -> vector<8x256xf32>
    %7 = arith.mulf %4, %4 : vector<8x256xf32>
    %8 = arith.mulf %6, %6 : vector<8x256xf32>
    %9 = arith.addf %7, %8 : vector<8x256xf32>
    %10 = math.sqrt %9 : vector<8x256xf32>
    %cst_8 = arith.constant dense<0xFF800000> : vector<8xf32>
    %11 = vector.multi_reduction <maximumf>, %10, %cst_8 [1] : vector<8x256xf32> to vector<8xf32>
    %12 = vector.shape_cast %11 : vector<8xf32> to vector<8x1xf32>
    %cst_9 = arith.constant 0.000000e+00 : f32
    %13 = vector.broadcast %cst_9 : f32 to vector<8x1xf32>
    %14 = arith.cmpf ogt, %12, %13 : vector<8x1xf32>
    %15 = tpu.reciprocal %12 {approx = true} : vector<8x1xf32> -> vector<8x1xf32>
    %cst_10 = arith.constant 0.000000e+00 : f32
    %16 = vector.broadcast %cst_10 : f32 to vector<8x1xf32>
    %17 = arith.select %14, %15, %16 : vector<8x1xi1>, vector<8x1xf32>
    %18 = arith.mulf %9, %10 : vector<8x256xf32>
    %19 = vector.broadcast %17 : vector<8x1xf32> to vector<8x256xf32>
    %20 = arith.mulf %18, %19 : vector<8x256xf32>
    %cst_11 = arith.constant 0.000000e+00 : f32
    %21 = vector.broadcast %cst_11 : f32 to vector<8x128xf32>
    %22 = vector.extract_strided_slice %20 {offsets = [0, 0], sizes = [8, 128], strides = [1, 1]} : vector<8x256xf32> to vector<8x128xf32>
    %23 = arith.addf %21, %22 : vector<8x128xf32>
    %24 = vector.extract_strided_slice %20 {offsets = [0, 128], sizes = [8, 128], strides = [1, 1]} : vector<8x256xf32> to vector<8x128xf32>
    %25 = arith.addf %23, %24 : vector<8x128xf32>
    %cst_12 = arith.constant dense<0.000000e+00> : vector<128xf32>
    %26 = vector.multi_reduction <add>, %25, %cst_12 [0] : vector<8x128xf32> to vector<128xf32>
    %27 = vector.shape_cast %26 : vector<128xf32> to vector<1x128xf32>
    %c0_13 = arith.constant 0 : index
    %c0_14 = arith.constant 0 : index
    %28 = vector.load %arg5[%c0_13, %c0_14] : memref<1x128xf32, #tpu.memory_space<vmem>>, vector<1x128xf32>
    tpu.vector_store %arg5[%c0_13, %c0_14], %27 {strides = array<i32>} : memref<1x128xf32, #tpu.memory_space<vmem>>, vector<1x128xf32>,
    return
  }
  func.func @transform_0(%arg0: i32) -> (i32, i32) {
    %c0_i32 = arith.constant 0 : i32
    %c0_i32_0 = arith.constant 0 : i32
    return %arg0, %c0_i32 : i32, i32
  }
  func.func @transform_1(%arg0: i32) -> (i32, i32) {
    %c0_i32 = arith.constant 0 : i32
    %c0_i32_0 = arith.constant 0 : i32
    return %arg0, %c0_i32 : i32, i32
  }
  func.func @transform_2(%arg0: i32) -> (i32, i32) {
    %c0_i32 = arith.constant 0 : i32
    %c0_i32_0 = arith.constant 0 : i32
    %c0_i32_1 = arith.constant 0 : i32
    return %c0_i32, %c0_i32_0 : i32, i32
  }
  func.func @transform_3(%arg0: i32) -> (i32, i32) {
    %c0_i32 = arith.constant 0 : i32
    %c0_i32_0 = arith.constant 0 : i32
    %c0_i32_1 = arith.constant 0 : i32
    return %c0_i32, %c0_i32_0 : i32, i32
  }
  func.func @transform_4(%arg0: i32) -> (i32, i32) {
    %c0_i32 = arith.constant 0 : i32
    %c0_i32_0 = arith.constant 0 : i32
    return %arg0, %c0_i32 : i32, i32
  }
}

</mosaic_0001>

<bundles_post_ra>
// kernel: tpu_custom_call.1
= control target key start
LH: loop header
LB: loop body
LE: loop exit
PB: predicated region body
PF: predicated region fallthrough
CT: control target
= control target key end

     0   :  { %9 = vsyncpa [#allocation3], 0  ;;  %s569_s0 = inlined_call_operand.hbm [shape: f32[8,256], index: 0, kind: input, shape index: {}]   ;;  %s570_s1 = inlined_call_operand.hbm [shape: f32[8,256], index: 1, kind: input, shape index: {}]   ;;  %s571_s2 = inlined_call_operand.hbm [shape: f32[256,256], index: 2, kind: input, shape index: {}]   ;;  %s572_s3 = inlined_call_operand.hbm [shape: f32[256,256], index: 3, kind: input, shape index: {}]   ;;  %s573_s4 = inlined_call_operand.hbm [shape: f32[1,128], index: 4, kind: output, shape index: {}]  }
   0x1   :  { %10 = vsyncpa [#allocation6], 0 }
   0x2   :  { %11 = vsyncpa [#allocation9], 0 }
   0x3   :  { %12 = vsyncpa [#allocation4], 0  ;;  %s522_s15 = smov [#allocation5]   ;;  %s523_s17 = smov [#allocation2]  }
   0x4   :  { %s29_s16 = sshll.u32 %s522_s15, 4  ;;  %s19_s18 = sshll.u32 %s523_s17, 4  ;;  %s30_s16 = int_to_ptr.vmem [resolvable:$true] %s29_s16  ;;  %s20_s18 = int_to_ptr.vmem [resolvable:$true] %s19_s18 }
   0x5   :  { %s422_s19 = scalar_lea.vmem %s30_s16, 256  ;;  %p427_p1 = scmp.lt.s32.totalorder %s30_s16, %s30_s16 }
   0x6   :  { %p423_p0 = scmp.ne.s32.totalorder %s30_s16, %s422_s19  ;;  %p428_p2 = scmp.lt.s32.totalorder %s422_s19, %s422_s19 }
   0x8   :  { %p429_p3 = por %p428_p2, %p427_p1 }
   0xa   :  { %p430_p4 = pnand %p429_p3, %p423_p0 }
   0xc   :  { %433 = shalt.err (!%p430_p4)
}
   0xd   :  { %32 = dma.hbm_to_vmem [thread:$0]  %s570_s1, 256, %s30_s16, [#allocation6]  }
   0xe   :  { %s442_s22 = scalar_lea.vmem %s20_s18, 256  ;;  %p447_p6 = scmp.lt.s32.totalorder %s20_s18, %s20_s18 }
   0xf   :  { %p443_p5 = scmp.ne.s32.totalorder %s20_s18, %s442_s22  ;;  %p448_p7 = scmp.lt.s32.totalorder %s442_s22, %s442_s22 }
  0x11   :  { %p449_p8 = por %p448_p7, %p447_p6 }
  0x13   :  { %p450_p9 = pnand %p449_p8, %p443_p5 }
  0x15   :  { %453 = shalt.err (!%p450_p9)
}
  0x16   :  { %22 = dma.hbm_to_vmem [thread:$0]  %s569_s0, 256, %s20_s18, [#allocation3]  }
  0x17   :  { %s524_s25 = smov [#allocation7]  }
  0x18   :  { %s38_s26 = sshll.u32 %s524_s25, 4  ;;  %s39_s26 = int_to_ptr.vmem [resolvable:$true] %s38_s26 }
  0x19   :  { %s462_s27 = scalar_lea.vmem %s39_s26, 8192  ;;  %p467_p11 = scmp.lt.s32.totalorder %s39_s26, %s39_s26 }
  0x1a   :  { %p463_p10 = scmp.ne.s32.totalorder %s39_s26, %s462_s27  ;;  %p468_p12 = scmp.lt.s32.totalorder %s462_s27, %s462_s27 }
  0x1c   :  { %p469_p13 = por %p468_p12, %p467_p11 }
  0x1e   :  { %p470_p0 = pnand %p469_p13, %p463_p10 }
  0x20   :  { %473 = shalt.err (!%p470_p0)
}
  0x21   :  { %s525_s1 = smov 256   ;;  %s526_s28 = smov 16  }
  0x22   :  { %44 = dma.hbm_to_vmem [thread:$0]  %s571_s2, 8192, %s39_s26, [#allocation6], %s525_s1, %s525_s1, %s526_s28  }
  0x23   :  { %s527_s5 = smov [#allocation8]  }
  0x24   :  { %s50_s6 = sshll.u32 %s527_s5, 4  ;;  %s51_s6 = int_to_ptr.vmem [resolvable:$true] %s50_s6 }
  0x25   :  { %s482_s0 = scalar_lea.vmem %s51_s6, 8192  ;;  %p487_p2 = scmp.lt.s32.totalorder %s51_s6, %s51_s6 }
  0x26   :  { %p483_p1 = scmp.ne.s32.totalorder %s51_s6, %s482_s0  ;;  %p488_p3 = scmp.lt.s32.totalorder %s482_s0, %s482_s0 }
  0x28   :  { %p489_p4 = por %p488_p3, %p487_p2 }
  0x2a   :  { %p490_p5 = pnand %p489_p4, %p483_p1 }
  0x2c   :  { %493 = shalt.err (!%p490_p5)
}
  0x2d   :  { %56 = dma.hbm_to_vmem [thread:$0]  %s572_s3, 8192, %s51_s6, [#allocation9], %s525_s1, %s525_s1, %s526_s28  }
  0x2e   :  { %514 = dma.done.wait [#allocation3], 256  }
  0x2f   :  { %515 = vsyncadd [#allocation3], 4294967040 }
  0x30   :  { %516 = dma.done.wait [#allocation6], 8448  }
  0x31   :  { %517 = vsyncadd [#allocation6], 4294958848 }
  0x32   :  { %518 = dma.done.wait [#allocation9], 8192  }
  0x33   :  { %519 = vsyncadd [#allocation9], 4294959104  ;;  %v106_v0 = vld [vmem:[#allocation7 + $0xf8] sm:$0xff]  ;;  %v105_v2 = vld [vmem:[#allocation7 + $0xf0] sm:$0xff]  ;;  %s528_s2 = smov [#allocation10]  }
  0x34   :  { %v241_v1 = vld [vmem:[#allocation8 + $0xf8] sm:$0xff]  ;;  %139 = vmatprep.subr.mxu0 %v106_v0  ;;  %v240_v3 = vld [vmem:[#allocation8 + $0xf0] sm:$0xff]  ;;  %v104_v4 = vld [vmem:[#allocation7 + $0xe8] sm:$0xff]  ;;  %s390_s3 = sshll.u32 %s528_s2, 4  ;;  %s391_s3 = int_to_ptr.vmem [resolvable:$true] %s390_s3 }
  0x35   :  { %274 = vmatprep.subr.mxu1 %v241_v1  ;;  %v239_v5 = vld [vmem:[#allocation8 + $0xe8] sm:$0xff]  ;;  %140 = vmatpush1.msra.mxu0 %v105_v2  ;;  %v103_v6 = vld [vmem:[#allocation7 + $0xe0] sm:$0xff]  ;;  %v102_v8 = vld [vmem:[#allocation7 + $0xd8] sm:$0xff]  ;;  %s494_s9 = scalar_lea.vmem %s391_s3, 16  ;;  %s498_s10 = scalar_lea.vmem %s391_s3, 32 }
  0x36   :  { %275 = vmatpush1.msra.mxu1 %v240_v3  ;;  %v238_v7 = vld [vmem:[#allocation8 + $0xe0] sm:$0xff]  ;;  %141 = vmatprep.subr.mxu0 %v104_v4  ;;  %v237_v9 = vld [vmem:[#allocation8 + $0xd8] sm:$0xff]  ;;  %v101_v10 = vld [vmem:[#allocation7 + $0xd0] sm:$0xff]  ;;  %p495_p6 = scmp.ne.s32.totalorder %s391_s3, %s494_s9  ;;  %p499_p7 = scmp.lt.s32.totalorder %s391_s3, %s391_s3 }
  0x37   :  { %276 = vmatprep.subr.mxu1 %v239_v5  ;;  %v236_v11 = vld [vmem:[#allocation8 + $0xd0] sm:$0xff]  ;;  %142 = vmatpush1.msra.mxu0 %v103_v6  ;;  %v100_v12 = vld [vmem:[#allocation7 + $0xc8] sm:$0xff]  ;;  %v99_v14 = vld [vmem:[#allocation7 + $0xc0] sm:$0xff]  ;;  %p500_p8 = scmp.lt.s32.totalorder %s498_s10, %s494_s9 }
  0x38   :  { %277 = vmatpush1.msra.mxu1 %v238_v7  ;;  %v235_v13 = vld [vmem:[#allocation8 + $0xc8] sm:$0xff]  ;;  %143 = vmatprep.subr.mxu0 %v102_v8  ;;  %v234_v15 = vld [vmem:[#allocation8 + $0xc0] sm:$0xff]  ;;  %v98_v16 = vld [vmem:[#allocation7 + $0xb8] sm:$0xff] }
  0x39   :  { %278 = vmatprep.subr.mxu1 %v237_v9  ;;  %144 = vmatpush1.msra.mxu0 %v101_v10  ;;  %v233_v17 = vld [vmem:[#allocation8 + $0xb8] sm:$0xff]  ;;  %v97_v18 = vld [vmem:[#allocation7 + $0xb0] sm:$0xff]  ;;  %v96_v20 = vld [vmem:[#allocation7 + $0xa8] sm:$0xff]  ;;  %p501_p9 = por %p500_p8, %p499_p7 }
  0x3a   :  { %279 = vmatpush1.msra.mxu1 %v236_v11  ;;  %145 = vmatprep.subr.mxu0 %v100_v12  ;;  %v232_v19 = vld [vmem:[#allocation8 + $0xb0] sm:$0xff]  ;;  %v231_v21 = vld [vmem:[#allocation8 + $0xa8] sm:$0xff]  ;;  %v95_v22 = vld [vmem:[#allocation7 + $0xa0] sm:$0xff] }
  0x3b   :  { %280 = vmatprep.subr.mxu1 %v235_v13  ;;  %146 = vmatpush1.msra.mxu0 %v99_v14  ;;  %v230_v23 = vld [vmem:[#allocation8 + $0xa0] sm:$0xff]  ;;  %v94_v24 = vld [vmem:[#allocation7 + $0x98] sm:$0xff]  ;;  %v93_v26 = vld [vmem:[#allocation7 + $0x90] sm:$0xff]  ;;  %p502_p10 = pnand %p501_p9, %p495_p6 }
  0x3c   :  { %281 = vmatpush1.msra.mxu1 %v234_v15  ;;  %147 = vmatprep.subr.mxu0 %v98_v16  ;;  %v229_v25 = vld [vmem:[#allocation8 + $0x98] sm:$0xff]  ;;  %v228_v27 = vld [vmem:[#allocation8 + $0x90] sm:$0xff]  ;;  %v92_v28 = vld [vmem:[#allocation7 + $0x88] sm:$0xff] }
  0x3d   :  { %282 = vmatprep.subr.mxu1 %v233_v17  ;;  %148 = vmatpush1.msra.mxu0 %v97_v18  ;;  %v227_v29 = vld [vmem:[#allocation8 + $0x88] sm:$0xff]  ;;  %v91_v30 = vld [vmem:[#allocation7 + $0x80] sm:$0xff]  ;;  %v90_v32 = vld [vmem:[#allocation7 + $0x78] sm:$0xff] }
  0x3e   :  { %283 = vmatpush1.msra.mxu1 %v232_v19  ;;  %149 = vmatprep.subr.mxu0 %v96_v20  ;;  %v226_v31 = vld [vmem:[#allocation8 + $0x80] sm:$0xff]  ;;  %v225_v33 = vld [vmem:[#allocation8 + $0x78] sm:$0xff]  ;;  %v89_v34 = vld [vmem:[#allocation7 + $0x70] sm:$0xff] }
  0x3f   :  { %284 = vmatprep.subr.mxu1 %v231_v21  ;;  %150 = vmatpush1.msra.mxu0 %v95_v22  ;;  %v224_v35 = vld [vmem:[#allocation8 + $0x70] sm:$0xff]  ;;  %v88_v36 = vld [vmem:[#allocation7 + $0x68] sm:$0xff]  ;;  %v87_v38 = vld [vmem:[#allocation7 + $0x60] sm:$0xff] }
  0x40   :  { %285 = vmatpush1.msra.mxu1 %v230_v23  ;;  %151 = vmatprep.subr.mxu0 %v94_v24  ;;  %v223_v37 = vld [vmem:[#allocation8 + $0x68] sm:$0xff]  ;;  %v222_v39 = vld [vmem:[#allocation8 + $0x60] sm:$0xff]  ;;  %v86_v40 = vld [vmem:[#allocation7 + $0x58] sm:$0xff] }
  0x41   :  { %286 = vmatprep.subr.mxu1 %v229_v25  ;;  %152 = vmatpush1.msra.mxu0 %v93_v26  ;;  %v221_v41 = vld [vmem:[#allocation8 + $0x58] sm:$0xff]  ;;  %v85_v42 = vld [vmem:[#allocation7 + $0x50] sm:$0xff]  ;;  %v84_v44 = vld [vmem:[#allocation7 + $0x48] sm:$0xff] }
  0x42   :  { %287 = vmatpush1.msra.mxu1 %v228_v27  ;;  %153 = vmatprep.subr.mxu0 %v92_v28  ;;  %v220_v43 = vld [vmem:[#allocation8 + $0x50] sm:$0xff]  ;;  %v219_v45 = vld [vmem:[#allocation8 + $0x48] sm:$0xff]  ;;  %v83_v46 = vld [vmem:[#allocation7 + $0x40] sm:$0xff] }
  0x43   :  { %288 = vmatprep.subr.mxu1 %v227_v29  ;;  %154 = vmatpush1.msra.mxu0 %v91_v30  ;;  %v218_v47 = vld [vmem:[#allocation8 + $0x40] sm:$0xff]  ;;  %v82_v48 = vld [vmem:[#allocation7 + $0x38] sm:$0xff]  ;;  %v81_v50 = vld [vmem:[#allocation7 + $0x30] sm:$0xff] }
  0x44   :  { %289 = vmatpush1.msra.mxu1 %v226_v31  ;;  %155 = vmatprep.subr.mxu0 %v90_v32  ;;  %v217_v49 = vld [vmem:[#allocation8 + $0x38] sm:$0xff]  ;;  %v216_v51 = vld [vmem:[#allocation8 + $0x30] sm:$0xff]  ;;  %v80_v52 = vld [vmem:[#allocation7 + $0x28] sm:$0xff] }
  0x45   :  { %290 = vmatprep.subr.mxu1 %v225_v33  ;;  %156 = vmatpush1.msra.mxu0 %v89_v34  ;;  %v215_v53 = vld [vmem:[#allocation8 + $0x28] sm:$0xff]  ;;  %v79_v54 = vld [vmem:[#allocation7 + $0x20] sm:$0xff]  ;;  %v78_v56 = vld [vmem:[#allocation7 + $0x18] sm:$0xff] }
  0x46   :  { %291 = vmatpush1.msra.mxu1 %v224_v35  ;;  %157 = vmatprep.subr.mxu0 %v88_v36  ;;  %v214_v55 = vld [vmem:[#allocation8 + $0x20] sm:$0xff]  ;;  %v213_v57 = vld [vmem:[#allocation8 + $0x18] sm:$0xff]  ;;  %v77_v58 = vld [vmem:[#allocation7 + $0x10] sm:$0xff] }
  0x47   :  { %292 = vmatprep.subr.mxu1 %v223_v37  ;;  %158 = vmatpush1.msra.mxu0 %v87_v38  ;;  %v212_v59 = vld [vmem:[#allocation8 + $0x10] sm:$0xff]  ;;  %v76_v60 = vld [vmem:[#allocation7 + $0x8] sm:$0xff]  ;;  %v75_v62 = vld [vmem:[#allocation7] sm:$0xff] }
  0x48   :  { %293 = vmatpush1.msra.mxu1 %v222_v39  ;;  %159 = vmatprep.subr.mxu0 %v86_v40  ;;  %v211_v61 = vld [vmem:[#allocation8 + $0x8] sm:$0xff]  ;;  %v210_v63 = vld [vmem:[#allocation8] sm:$0xff]  ;;  %v138_v0 = vld [vmem:[#allocation7 + $0x1f8] sm:$0xff] }
  0x49   :  { %294 = vmatprep.subr.mxu1 %v221_v41  ;;  %160 = vmatpush1.msra.mxu0 %v85_v42  ;;  %v273_v1 = vld [vmem:[#allocation8 + $0x1f8] sm:$0xff]  ;;  %v137_v2 = vld [vmem:[#allocation7 + $0x1f0] sm:$0xff]  ;;  %v136_v4 = vld [vmem:[#allocation7 + $0x1e8] sm:$0xff] }
  0x4a   :  { %295 = vmatpush1.msra.mxu1 %v220_v43  ;;  %161 = vmatprep.subr.mxu0 %v84_v44  ;;  %v272_v3 = vld [vmem:[#allocation8 + $0x1f0] sm:$0xff]  ;;  %v271_v5 = vld [vmem:[#allocation8 + $0x1e8] sm:$0xff]  ;;  %v135_v6 = vld [vmem:[#allocation7 + $0x1e0] sm:$0xff] }
  0x4b   :  { %296 = vmatprep.subr.mxu1 %v219_v45  ;;  %162 = vmatpush1.msra.mxu0 %v83_v46  ;;  %v270_v7 = vld [vmem:[#allocation8 + $0x1e0] sm:$0xff]  ;;  %v134_v8 = vld [vmem:[#allocation7 + $0x1d8] sm:$0xff]  ;;  %v133_v10 = vld [vmem:[#allocation7 + $0x1d0] sm:$0xff] }
  0x4c   :  { %297 = vmatpush1.msra.mxu1 %v218_v47  ;;  %163 = vmatprep.subr.mxu0 %v82_v48  ;;  %v269_v9 = vld [vmem:[#allocation8 + $0x1d8] sm:$0xff]  ;;  %v268_v11 = vld [vmem:[#allocation8 + $0x1d0] sm:$0xff]  ;;  %v132_v12 = vld [vmem:[#allocation7 + $0x1c8] sm:$0xff] }
  0x4d   :  { %298 = vmatprep.subr.mxu1 %v217_v49  ;;  %164 = vmatpush1.msra.mxu0 %v81_v50  ;;  %v267_v13 = vld [vmem:[#allocation8 + $0x1c8] sm:$0xff]  ;;  %v131_v14 = vld [vmem:[#allocation7 + $0x1c0] sm:$0xff]  ;;  %v130_v16 = vld [vmem:[#allocation7 + $0x1b8] sm:$0xff] }
  0x4e   :  { %299 = vmatpush1.msra.mxu1 %v216_v51  ;;  %165 = vmatprep.subr.mxu0 %v80_v52  ;;  %v266_v15 = vld [vmem:[#allocation8 + $0x1c0] sm:$0xff]  ;;  %v265_v17 = vld [vmem:[#allocation8 + $0x1b8] sm:$0xff]  ;;  %v129_v18 = vld [vmem:[#allocation7 + $0x1b0] sm:$0xff] }
  0x4f   :  { %300 = vmatprep.subr.mxu1 %v215_v53  ;;  %166 = vmatpush1.msra.mxu0 %v79_v54  ;;  %v264_v19 = vld [vmem:[#allocation8 + $0x1b0] sm:$0xff]  ;;  %v128_v20 = vld [vmem:[#allocation7 + $0x1a8] sm:$0xff]  ;;  %v127_v22 = vld [vmem:[#allocation7 + $0x1a0] sm:$0xff] }
  0x50   :  { %301 = vmatpush1.msra.mxu1 %v214_v55  ;;  %167 = vmatprep.subr.mxu0 %v78_v56  ;;  %v263_v21 = vld [vmem:[#allocation8 + $0x1a8] sm:$0xff]  ;;  %v262_v23 = vld [vmem:[#allocation8 + $0x1a0] sm:$0xff]  ;;  %v126_v24 = vld [vmem:[#allocation7 + $0x198] sm:$0xff] }
  0x51   :  { %302 = vmatprep.subr.mxu1 %v213_v57  ;;  %168 = vmatpush1.msra.mxu0 %v77_v58  ;;  %v261_v25 = vld [vmem:[#allocation8 + $0x198] sm:$0xff]  ;;  %v125_v26 = vld [vmem:[#allocation7 + $0x190] sm:$0xff]  ;;  %v124_v28 = vld [vmem:[#allocation7 + $0x188] sm:$0xff] }
  0x52   :  { %303 = vmatpush1.msra.mxu1 %v212_v59  ;;  %169 = vmatprep.subr.mxu0 %v76_v60  ;;  %v260_v27 = vld [vmem:[#allocation8 + $0x190] sm:$0xff]  ;;  %v259_v29 = vld [vmem:[#allocation8 + $0x188] sm:$0xff]  ;;  %v123_v30 = vld [vmem:[#allocation7 + $0x180] sm:$0xff] }
  0x53   :  { %304 = vmatprep.subr.mxu1 %v211_v61  ;;  %170 = vmatpush1.msra.mxu0 %v75_v62  ;;  %v258_v31 = vld [vmem:[#allocation8 + $0x180] sm:$0xff]  ;;  %v122_v32 = vld [vmem:[#allocation7 + $0x178] sm:$0xff]  ;;  %v121_v34 = vld [vmem:[#allocation7 + $0x170] sm:$0xff] }
  0x54   :  { %305 = vmatpush1.msra.mxu1 %v210_v63  ;;  %171 = vmatprep.subr.mxu0 %v138_v0  ;;  %v257_v33 = vld [vmem:[#allocation8 + $0x178] sm:$0xff]  ;;  %v256_v35 = vld [vmem:[#allocation8 + $0x170] sm:$0xff]  ;;  %v120_v36 = vld [vmem:[#allocation7 + $0x168] sm:$0xff] }
  0x55   :  { %306 = vmatprep.subr.mxu1 %v273_v1  ;;  %172 = vmatpush2.msra.mxu0 %v137_v2  ;;  %v255_v37 = vld [vmem:[#allocation8 + $0x168] sm:$0xff]  ;;  %v119_v38 = vld [vmem:[#allocation7 + $0x160] sm:$0xff]  ;;  %v118_v40 = vld [vmem:[#allocation7 + $0x158] sm:$0xff] }
  0x56   :  { %307 = vmatpush2.msra.mxu1 %v272_v3  ;;  %173 = vmatprep.subr.mxu0 %v136_v4  ;;  %v254_v39 = vld [vmem:[#allocation8 + $0x160] sm:$0xff]  ;;  %v253_v41 = vld [vmem:[#allocation8 + $0x158] sm:$0xff]  ;;  %v117_v42 = vld [vmem:[#allocation7 + $0x150] sm:$0xff] }
  0x57   :  { %308 = vmatprep.subr.mxu1 %v271_v5  ;;  %174 = vmatpush2.msra.mxu0 %v135_v6  ;;  %v252_v43 = vld [vmem:[#allocation8 + $0x150] sm:$0xff]  ;;  %v116_v44 = vld [vmem:[#allocation7 + $0x148] sm:$0xff]  ;;  %v115_v46 = vld [vmem:[#allocation7 + $0x140] sm:$0xff] }
  0x58   :  { %309 = vmatpush2.msra.mxu1 %v270_v7  ;;  %175 = vmatprep.subr.mxu0 %v134_v8  ;;  %v251_v45 = vld [vmem:[#allocation8 + $0x148] sm:$0xff]  ;;  %v250_v47 = vld [vmem:[#allocation8 + $0x140] sm:$0xff]  ;;  %v114_v48 = vld [vmem:[#allocation7 + $0x138] sm:$0xff] }
  0x59   :  { %310 = vmatprep.subr.mxu1 %v269_v9  ;;  %176 = vmatpush2.msra.mxu0 %v133_v10  ;;  %v249_v49 = vld [vmem:[#allocation8 + $0x138] sm:$0xff]  ;;  %v113_v50 = vld [vmem:[#allocation7 + $0x130] sm:$0xff]  ;;  %v112_v52 = vld [vmem:[#allocation7 + $0x128] sm:$0xff] }
  0x5a   :  { %311 = vmatpush2.msra.mxu1 %v268_v11  ;;  %177 = vmatprep.subr.mxu0 %v132_v12  ;;  %v248_v51 = vld [vmem:[#allocation8 + $0x130] sm:$0xff]  ;;  %v247_v53 = vld [vmem:[#allocation8 + $0x128] sm:$0xff]  ;;  %v111_v54 = vld [vmem:[#allocation7 + $0x120] sm:$0xff] }
  0x5b   :  { %312 = vmatprep.subr.mxu1 %v267_v13  ;;  %178 = vmatpush2.msra.mxu0 %v131_v14  ;;  %v246_v55 = vld [vmem:[#allocation8 + $0x120] sm:$0xff]  ;;  %v70_v56 = vld [vmem:[#allocation2 + $0x8] sm:$0xff]  ;;  %v72_v57 = vld [vmem:[#allocation5 + $0x8] sm:$0xff] }
  0x5c   :  { %313 = vmatpush2.msra.mxu1 %v266_v15  ;;  %179 = vmatprep.subr.mxu0 %v130_v16  ;;  %v110_v58 = vld [vmem:[#allocation7 + $0x118] sm:$0xff]  ;;  %v109_v60 = vld [vmem:[#allocation7 + $0x110] sm:$0xff]  ;;  %v69_v62 = vld [vmem:[#allocation2] sm:$0xff]  ;;  %v74_v2 = vsub.f32 %v70_v56, %v72_v57 }
  0x5d   :  { %314 = vmatprep.subr.mxu1 %v265_v17  ;;  %180 = vmatpush2.msra.mxu0 %v129_v18  ;;  %v245_v59 = vld [vmem:[#allocation8 + $0x118] sm:$0xff]  ;;  %v244_v61 = vld [vmem:[#allocation8 + $0x110] sm:$0xff]  ;;  %v108_v0 = vld [vmem:[#allocation7 + $0x108] sm:$0xff] }
  0x5e   :  { %315 = vmatpush2.msra.mxu1 %v264_v19  ;;  %181 = vmatprep.subr.mxu0 %v128_v20  ;;  %v71_v63 = vld [vmem:[#allocation5] sm:$0xff]  ;;  %v243_v1 = vld [vmem:[#allocation8 + $0x108] sm:$0xff]  ;;  %v107_v3 = vld [vmem:[#allocation7 + $0x100] sm:$0xff] }
  0x5f   :  { %316 = vmatprep.subr.mxu1 %v263_v21  ;;  %182 = vmatpush2.msra.mxu0 %v127_v22  ;;  %v242_v4 = vld [vmem:[#allocation8 + $0x100] sm:$0xff]  ;;  %v73_v5 = vsub.f32 %v69_v62, %v71_v63 }
  0x60   :  { %317 = vmatpush2.msra.mxu1 %v262_v23  ;;  %183 = vmatprep.subr.mxu0 %v126_v24 }
  0x61   :  { %318 = vmatprep.subr.mxu1 %v261_v25  ;;  %184 = vmatpush2.msra.mxu0 %v125_v26 }
  0x62   :  { %319 = vmatpush2.msra.mxu1 %v260_v27  ;;  %185 = vmatprep.subr.mxu0 %v124_v28 }
  0x63   :  { %320 = vmatprep.subr.mxu1 %v259_v29  ;;  %186 = vmatpush2.msra.mxu0 %v123_v30 }
  0x64   :  { %321 = vmatpush2.msra.mxu1 %v258_v31  ;;  %187 = vmatprep.subr.mxu0 %v122_v32 }
  0x65   :  { %322 = vmatprep.subr.mxu1 %v257_v33  ;;  %188 = vmatpush2.msra.mxu0 %v121_v34 }
  0x66   :  { %323 = vmatpush2.msra.mxu1 %v256_v35  ;;  %189 = vmatprep.subr.mxu0 %v120_v36 }
  0x67   :  { %324 = vmatprep.subr.mxu1 %v255_v37  ;;  %190 = vmatpush2.msra.mxu0 %v119_v38 }
  0x68   :  { %325 = vmatpush2.msra.mxu1 %v254_v39  ;;  %191 = vmatprep.subr.mxu0 %v118_v40 }
  0x69   :  { %326 = vmatprep.subr.mxu1 %v253_v41  ;;  %192 = vmatpush2.msra.mxu0 %v117_v42 }
  0x6a   :  { %327 = vmatpush2.msra.mxu1 %v252_v43  ;;  %193 = vmatprep.subr.mxu0 %v116_v44 }
  0x6b   :  { %328 = vmatprep.subr.mxu1 %v251_v45  ;;  %194 = vmatpush2.msra.mxu0 %v115_v46 }
  0x6c   :  { %329 = vmatpush2.msra.mxu1 %v250_v47  ;;  %195 = vmatprep.subr.mxu0 %v114_v48 }
  0x6d   :  { %330 = vmatprep.subr.mxu1 %v249_v49  ;;  %196 = vmatpush2.msra.mxu0 %v113_v50 }
  0x6e   :  { %331 = vmatpush2.msra.mxu1 %v248_v51  ;;  %197 = vmatprep.subr.mxu0 %v112_v52 }
  0x6f   :  { %332 = vmatprep.subr.mxu1 %v247_v53  ;;  %198 = vmatpush2.msra.mxu0 %v111_v54 }
  0x70   :  { %333 = vmatpush2.msra.mxu1 %v246_v55  ;;  %199 = vmatprep.subr.mxu0 %v110_v58 }
  0x71   :  { %334 = vmatprep.subr.mxu1 %v245_v59  ;;  %200 = vmatpush2.msra.mxu0 %v109_v60 }
  0x72   :  { %335 = vmatpush2.msra.mxu1 %v244_v61  ;;  %201 = vmatprep.subr.mxu0 %v108_v0 }
  0x73   :  { %336 = vmatprep.subr.mxu1 %v243_v1  ;;  %202 = vmatpush2.msra.mxu0 %v107_v3 }
  0x74   :  { %203 = vmatprep.mubr.f32.mxu0 %v74_v2  ;;  %337 = vmatpush2.msra.mxu1 %v242_v4 }
  0x75   :  { %338 = vmatprep.mubr.f32.mxu1 %v74_v2  ;;  %204 = vmatmul.mubr.f32.vlgmr.msra.gmra.mxu0 %v73_v5 }
  0x76   :  { %339 = vmatmul.mubr.f32.vlgmr.msra.gmra.mxu1 %v73_v5 }
 0x135   :  { %v205_v6 = vpop.f32.mrf.mxu0 }
 0x136   :  { %v340_v7 = vpop.f32.mrf.mxu1  ;;  %v345_v8 = vmul.f32 %v205_v6, %v205_v6 }
 0x137   :  { %v347_v9 = vmul.f32 %v340_v7, %v340_v7  ;;  %v207_v10 = vpop.f32.mrf.mxu0 }
 0x138   :  { %v342_v11 = vpop.f32.mrf.mxu1  ;;  %v346_v13 = vmul.f32 %v207_v10, %v207_v10 }
 0x139   :  { %v349_v12 = vadd.f32 %v347_v9, %v345_v8  ;;  %v348_v14 = vmul.f32 %v342_v11, %v342_v11 }
 0x13b   :  { %v350_v15 = vadd.f32 %v348_v14, %v346_v13  ;;  %408 = vrsqrt.f32 %v349_v12  ;;  %vm353_vm0 = vcmp.eq.f32.partialorder %v349_v12, inf  ;;  %v356_v19 = vand.u32 2147483648, %v349_v12 }
 0x13c   :  { %vm355_vm1 = vcmp.eq.f32.partialorder %v349_v12, 0.0 }
 0x13d   :  { %410 = vrsqrt.f32 %v350_v15  ;;  %vm360_vm2 = vcmp.eq.f32.partialorder %v350_v15, inf  ;;  %v363_v23 = vand.u32 2147483648, %v350_v15  ;;  %vm362_vm3 = vcmp.eq.f32.partialorder %v350_v15, 0.0 }
 0x148   :  { %v409_v16 = vpop.eup %408 }
 0x149   :  { %v352_v17 = vmul.f32 %v409_v16, %v349_v12 }
 0x14a   :  { %v411_v18 = vpop.eup %410 }
 0x14b   :  { %v354_v20 = vsel %vm353_vm0, %v349_v12, %v352_v17  ;;  %v359_v21 = vmul.f32 %v411_v18, %v350_v15 }
 0x14c   :  { %v357_v22 = vsel %vm355_vm1, %v356_v19, %v354_v20 }
 0x14d   :  { %v361_v24 = vsel %vm360_vm2, %v350_v15, %v359_v21  ;;  %v371_v25 = vmul.f32 %v357_v22, %v349_v12 }
 0x14e   :  { %v364_v26 = vsel %vm362_vm3, %v363_v23, %v361_v24 }
 0x14f   :  { %v365_v27 = vmax.f32 %v357_v22, %v364_v26  ;;  %v372_v28 = vmul.f32 %v364_v26, %v350_v15 }
 0x151   :  { %366 = vmax.xlane.f32.xlu0 %v365_v27 }
 0x1da   :  { %v367_v29 = vpop.xlane.xlu0 %366 }
 0x1db   :  { %412 = vrcp.f32 %v367_v29  ;;  %vm368_vm4 = vcmp.gt.f32.partialorder %v367_v29, 0.0 }
 0x1e8   :  { %v413_v30 = vpop.eup %412 }
 0x1e9   :  { %v370_v31 = vsel %vm368_vm4, %v413_v30, 0.0 }
 0x1ea   :  { %v373_v32 = vmul.f32 %v371_v25, %v370_v31  ;;  %v374_v33 = vmul.f32 %v372_v28, %v370_v31 }
 0x1ec   :  { %v376_v34 = vadd.f32 %v374_v33, %v373_v32 }
 0x1ee   :  { %v377_v35 = vrot.slane %v376_v34, 4 }
 0x1f0   :  { %v378_v36 = vadd.f32 %v377_v35, %v376_v34 }
 0x1f2   :  { %v379_v37 = vrot.slane %v378_v36, 2 }
 0x1f4   :  { %v380_v38 = vadd.f32 %v379_v37, %v378_v36 }
 0x1f6   :  { %v381_v39 = vrot.slane %v380_v38, 1 }
 0x1f8   :  { %v382_v40 = vadd.f32 %v381_v39, %v380_v38 }
 0x1fa   :  { %383 = vst [vmem:[#allocation10] sm:$0x1] %v382_v40 }
 0x1fb   :  { %505 = shalt.err (!%p502_p10)
}
 0x1fc   :  { %393 = dma.vmem_to_hbm [thread:$0]  %s391_s3, 16, %s573_s4, [#allocation4]  }
 0x1fd   :  { %520 = dma.done.wait [#allocation4], 16  }
 0x1fe   :  { %521 = vsyncadd [#allocation4], 4294967280 }
 0x1ff   :  { %397 = vsyncpa [#allocation3], 1 }
 0x200   :  { %398 = vsyncpa [#allocation6], 1 }
 0x201   :  { %399 = vsyncpa [#allocation9], 1 }
 0x202   :  { %400 = vsyncpa [#allocation4], 1 }

</bundles_post_ra>
